<compile_context>
chip_gen: v7x
topology: tpu7x:2x2x1
jax: 0.10.0
libtpu: 0.0.40
codegen_flags: <defaults>
</compile_context>

<pallas_src>
import functools

import jax
import jax.numpy as jnp
from jax.experimental import pallas as pl
from jax.experimental.pallas import tpu as pltpu


# ------------------------------ fused kernel -------------------------------- #
def _multi_task_loss_kernel(det_a_ref, det_b_ref,
                            seg_logits_ref, seg_labels_ref,
                            cls_logits_ref, cls_labels_ref,
                            logvars_ref,
                            out_ref,
                            seg_acc_ref,
                            *, seg_count, det_count, cls_count):
    n_i = pl.program_id(0)
    p_i = pl.program_id(1)
    is_first = jnp.logical_and(n_i == 0, p_i == 0)
    is_last = jnp.logical_and(n_i == pl.num_programs(0) - 1,
                              p_i == pl.num_programs(1) - 1)

    @pl.when(is_first)
    def _init():
        seg_acc_ref[...] = jnp.zeros_like(seg_acc_ref)

    # ---- segmentation CE partial sum for this (image, pixel-block) tile ----
    # seg_logits_ref: (C, R, 128) lane/sublane-dense, seg_labels_ref: (R, 128) int32
    x = seg_logits_ref[...].astype(jnp.float32)
    lab = seg_labels_ref[...]
    m = jnp.max(x, axis=0, keepdims=True)                       # (1, R, 128)
    s = jnp.sum(jnp.exp(x - m), axis=0)                         # (R, 128)
    lse = jnp.log(s) + m[0]                                     # (R, 128)
    cls_ids = jax.lax.broadcasted_iota(jnp.int32, x.shape, 0)   # (C, R, 128)
    picked = jnp.sum(jnp.where(cls_ids == lab[None, :, :], x, 0.0), axis=0)  # (R, 128)
    # padded pixels carry label -1 and contribute 0
    contrib = jnp.where(lab >= 0, lse - picked, 0.0)
    seg_acc_ref[...] += jnp.sum(contrib, keepdims=True)

    # ---- everything small runs exactly once, on the last grid step ----
    @pl.when(is_last)
    def _finalize():
        seg_loss = seg_acc_ref[...] * (1.0 / seg_count)          # (1, 1)

        # detection MSE on the resident (rows, 128) slabs (zero tails cancel)
        d = det_a_ref[...].astype(jnp.float32) - det_b_ref[...].astype(jnp.float32)
        det_loss = jnp.sum(d * d, keepdims=True) * (1.0 / det_count)   # (1, 1)

        # classification CE: (N, K) tiny, row-wise LSE
        lg = cls_logits_ref[...].astype(jnp.float32)             # (N, K)
        lab_c = cls_labels_ref[...]                              # (N, 1) int32
        nb, nk = lg.shape
        mc = jnp.max(lg, axis=-1, keepdims=True)
        lse_c = jnp.log(jnp.sum(jnp.exp(lg - mc), axis=-1, keepdims=True)) + mc
        ids = jax.lax.broadcasted_iota(jnp.int32, (nb, nk), 1)
        picked_c = jnp.sum(jnp.where(ids == lab_c, lg, 0.0), axis=-1, keepdims=True)
        cls_loss = jnp.sum(lse_c - picked_c, keepdims=True) * (1.0 / cls_count)  # (1, 1)

        # uncertainty weighting: sum_i exp(-s_i) * L_i + s_i
        lv = logvars_ref[...].astype(jnp.float32)                # (1, 3)
        prec = jnp.exp(-lv)
        total = (prec[:, 0:1] * det_loss + lv[:, 0:1]
                 + prec[:, 1:2] * seg_loss + lv[:, 1:2]
                 + prec[:, 2:3] * cls_loss + lv[:, 2:3])         # (1, 1)

        lane = jax.lax.broadcasted_iota(jnp.int32, (1, 4), 1)
        out_ref[...] = jnp.where(lane == 0, total,
                                 jnp.where(lane == 1, det_loss,
                                           jnp.where(lane == 2, seg_loss, cls_loss)))


# -------------------------------- wrapper ------------------------------------ #
def _round_up(x, m):
    return ((x + m - 1) // m) * m


def multi_task_loss(predictions, targets, log_vars):
    # ---- detection: lane-dense slab via a free reshape (no padded copy when possible)
    det_p = predictions["detection"]
    det_t = targets["detection"]
    det_n = det_p.size
    if det_n % 128 == 0:
        det_p2 = det_p.reshape(det_n // 128, 128)
        det_t2 = det_t.reshape(det_n // 128, 128)
    else:
        # TODO(synk): rare fallback materializes a padded copy; mask in-kernel instead if this path matters.
        pad = (-det_n) % 128
        det_p2 = jnp.pad(det_p.reshape(-1), (0, pad)).reshape(-1, 128)
        det_t2 = jnp.pad(det_t.reshape(-1), (0, pad)).reshape(-1, 128)

    # ---- segmentation: keep NCHW; free reshape to (N, C, P//128, 128), labels (N, P//128, 128)
    seg_logits = predictions["segmentation"]                 # (N, C, H, W), native dtype
    seg_labels = targets["segmentation"]                     # (N, H, W)
    n, c, h, w = seg_logits.shape
    p = h * w
    pr_raw = -(-p // 128)                                    # cdiv(P, 128) rows of 128 lanes
    tile_rows = min(64, pr_raw)                              # <= 8192 pixels per tile
    pr = _round_up(pr_raw, tile_rows)
    p_pad = pr * 128

    seg_logits_flat = seg_logits.reshape(n, c, p)
    seg_labels_flat = seg_labels.reshape(n, p).astype(jnp.int32)
    if p_pad != p:
        seg_logits_flat = jnp.pad(seg_logits_flat, ((0, 0), (0, 0), (0, p_pad - p)))
        seg_labels_flat = jnp.pad(seg_labels_flat, ((0, 0), (0, p_pad - p)),
                                  constant_values=-1)        # -1 = masked in kernel
    seg_logits_4d = seg_logits_flat.reshape(n, c, pr, 128)
    seg_labels_3d = seg_labels_flat.reshape(n, pr, 128)

    # ---- classification: (N, K) logits (native dtype), (N, 1) int32 labels
    cls_logits = predictions["classification"]
    cls_labels = targets["classification"].reshape(-1, 1).astype(jnp.int32)

    lv = log_vars.reshape(1, 3).astype(jnp.float32)

    grid = (n, pr // tile_rows)
    kernel = functools.partial(_multi_task_loss_kernel,
                               seg_count=n * p,
                               det_count=det_n,
                               cls_count=cls_logits.shape[0])

    out = pl.pallas_call(
        kernel,
        out_shape=jax.ShapeDtypeStruct((1, 4), jnp.float32),
        grid_spec=pltpu.PrefetchScalarGridSpec(
            num_scalar_prefetch=0,
            grid=grid,
            in_specs=[
                pl.BlockSpec(det_p2.shape, lambda ni, pi: (0, 0)),
                pl.BlockSpec(det_t2.shape, lambda ni, pi: (0, 0)),
                pl.BlockSpec((pl.Squeezed(), c, tile_rows, 128),
                             lambda ni, pi: (ni, 0, pi, 0)),
                pl.BlockSpec((pl.Squeezed(), tile_rows, 128),
                             lambda ni, pi: (ni, pi, 0)),
                pl.BlockSpec(cls_logits.shape, lambda ni, pi: (0, 0)),
                pl.BlockSpec(cls_labels.shape, lambda ni, pi: (0, 0)),
                pl.BlockSpec((1, 3), lambda ni, pi: (0, 0)),
            ],
            out_specs=pl.BlockSpec((1, 4), lambda ni, pi: (0, 0)),
            scratch_shapes=[pltpu.VMEM((1, 1), jnp.float32)],
        ),
        compiler_params=pltpu.CompilerParams(
            # Both grid axes reduce into a single scalar accumulator, so neither can
            # be megacore-"parallel" (see TODO above for the v7x 2-TC variant).
            dimension_semantics=("arbitrary", "arbitrary"),
            vmem_limit_bytes=32 * 1024 * 1024,
        ),
    )(det_p2, det_t2, seg_logits_4d, seg_labels_3d, cls_logits, cls_labels, lv)

    return {
        "total_loss": out[0, 0],
        "det_loss": out[0, 1],
        "seg_loss": out[0, 2],
        "cls_loss": out[0, 3],
    }


# ------------------------------ reference ------------------------------------ #
def _reference(predictions, targets, log_vars):
    det = jnp.mean((predictions["detection"].astype(jnp.float32)
                    - targets["detection"].astype(jnp.float32)) ** 2)
    logp = jax.nn.log_softmax(predictions["segmentation"].astype(jnp.float32), axis=1)
    seg = -jnp.mean(jnp.take_along_axis(
        logp, targets["segmentation"][:, None, :, :], axis=1))
    logpc = jax.nn.log_softmax(predictions["classification"].astype(jnp.float32), axis=-1)
    cls = -jnp.mean(jnp.take_along_axis(
        logpc, targets["classification"][:, None], axis=1))
    lv = log_vars.astype(jnp.float32)
    total = (jnp.exp(-lv[0]) * det + lv[0]
             + jnp.exp(-lv[1]) * seg + lv[1]
             + jnp.exp(-lv[2]) * cls + lv[2])
    return total, det, seg, cls


if __name__ == "__main__":
    key = jax.random.PRNGKey(0)
    k1, k2, k3, k4, k5, k6 = jax.random.split(key, 6)

    N, H, W = 2, 16, 16
    SEG_C = 3          # segmentation classes
    CLS_K = 10         # classification classes
    DET_C = 4          # detection regression channels

    predictions = {
        "detection": jax.random.normal(k1, (N, DET_C, H, W), jnp.float32),
        "segmentation": jax.random.normal(k2, (N, SEG_C, H, W), jnp.float32),
        "classification": jax.random.normal(k3, (N, CLS_K), jnp.float32),
    }
    targets = {
        "detection": jax.random.normal(k4, (N, DET_C, H, W), jnp.float32),
        "segmentation": jax.random.randint(k5, (N, H, W), 0, SEG_C, jnp.int32),
        "classification": jax.random.randint(k6, (N,), 0, CLS_K, jnp.int32),
    }

    # nn.Parameter(torch.zeros(3)) -> deterministic zero init
    log_vars = jnp.zeros((3,), jnp.float32)

    out = multi_task_loss(predictions, targets, log_vars)
    jax.block_until_ready(out)

    ref_total, ref_det, ref_seg, ref_cls = _reference(predictions, targets, log_vars)
    assert jnp.allclose(out["total_loss"], ref_total, rtol=1e-4, atol=1e-4)
    assert jnp.allclose(out["det_loss"], ref_det, rtol=1e-4, atol=1e-4)
    assert jnp.allclose(out["seg_loss"], ref_seg, rtol=1e-4, atol=1e-4)
    assert jnp.allclose(out["cls_loss"], ref_cls, rtol=1e-4, atol=1e-4)

    print("KERNEL_OK")
</pallas_src>

<mosaic_0001>
module attributes {stable_mosaic.version = 11 : i64} {
  func.func @_multi_task_loss_kernel(%arg0: i32, %arg1: i32, %arg2: memref<16x128xf32, #tpu.memory_space<vmem>>, %arg3: memref<16x128xf32, #tpu.memory_space<vmem>>, %arg4: memref<1x3x2x128xf32, #tpu.memory_space<vmem>>, %arg5: memref<1x2x128xi32, #tpu.memory_space<vmem>>, %arg6: memref<2x10xf32, #tpu.memory_space<vmem>>, %arg7: memref<2x1xi32, #tpu.memory_space<vmem>>, %arg8: memref<1x3xf32, #tpu.memory_space<vmem>>, %arg9: memref<1x4xf32, #tpu.memory_space<vmem>>, %arg10: memref<1x1xf32, #tpu.memory_space<vmem>>) attributes {dimension_semantics = [#tpu.dimension_semantics<arbitrary>, #tpu.dimension_semantics<arbitrary>], iteration_bounds = array<i64: 2, 1>, scalar_prefetch = 0 : i64, scratch_operands = 1 : i64, tpu.core_type = #tpu.core_type<tc>, window_params = [{pipeline_mode = #tpu.pipeline_mode<synchronous>, transform_indices = @transform_0, window_bounds = array<i64: 16, 128>}, {pipeline_mode = #tpu.pipeline_mode<synchronous>, transform_indices = @transform_1, window_bounds = array<i64: 16, 128>}, {transform_indices = @transform_2, window_bounds = array<i64: 1, 3, 2, 128>}, {transform_indices = @transform_3, window_bounds = array<i64: 1, 2, 128>}, {pipeline_mode = #tpu.pipeline_mode<synchronous>, transform_indices = @transform_4, window_bounds = array<i64: 2, 10>}, {pipeline_mode = #tpu.pipeline_mode<synchronous>, transform_indices = @transform_5, window_bounds = array<i64: 2, 1>}, {pipeline_mode = #tpu.pipeline_mode<synchronous>, transform_indices = @transform_6, window_bounds = array<i64: 1, 3>}, {pipeline_mode = #tpu.pipeline_mode<synchronous>, transform_indices = @transform_7, window_bounds = array<i64: 1, 4>}]} {
    %c0_i32 = arith.constant 0 : i32
    %0 = arith.cmpi eq, %arg0, %c0_i32 : i32
    %c0_i32_0 = arith.constant 0 : i32
    %1 = arith.cmpi eq, %arg1, %c0_i32_0 : i32
    %2 = arith.andi %0, %1 : i1
    %c1_i32 = arith.constant 1 : i32
    %3 = arith.cmpi eq, %arg0, %c1_i32 : i32
    %c0_i32_1 = arith.constant 0 : i32
    %4 = arith.cmpi eq, %arg1, %c0_i32_1 : i32
    %5 = arith.andi %3, %4 : i1
    %6 = arith.extui %2 : i1 to i32
    %c0_i32_2 = arith.constant 0 : i32
    %7 = arith.cmpi ne, %6, %c0_i32_2 : i32
    scf.if %7 {
      %cst_20 = arith.constant 0.000000e+00 : f32
      %43 = vector.broadcast %cst_20 : f32 to vector<1x1xf32>
      %c0_21 = arith.constant 0 : index
      %c0_22 = arith.constant 0 : index
      %44 = vector.load %arg10[%c0_21, %c0_22] : memref<1x1xf32, #tpu.memory_space<vmem>>, vector<1x1xf32>
      tpu.vector_store %arg10[%c0_21, %c0_22], %43 {strides = array<i32>} : memref<1x1xf32, #tpu.memory_space<vmem>>, vector<1x1xf32>,
    } else {
    }
    %c0 = arith.constant 0 : index
    %c0_3 = arith.constant 0 : index
    %c0_4 = arith.constant 0 : index
    %c0_5 = arith.constant 0 : index
    %8 = vector.load %arg4[%c0, %c0_3, %c0_4, %c0_5] : memref<1x3x2x128xf32, #tpu.memory_space<vmem>>, vector<1x3x2x128xf32>
    %9 = vector.shape_cast %8 : vector<1x3x2x128xf32> to vector<3x2x128xf32>
    %c0_6 = arith.constant 0 : index
    %c0_7 = arith.constant 0 : index
    %c0_8 = arith.constant 0 : index
    %10 = vector.load %arg5[%c0_6, %c0_7, %c0_8] : memref<1x2x128xi32, #tpu.memory_space<vmem>>, vector<1x2x128xi32>
    %11 = vector.shape_cast %10 : vector<1x2x128xi32> to vector<2x128xi32>
    %cst = arith.constant dense<0xFF800000> : vector<2x128xf32>
    %12 = vector.multi_reduction <maximumf>, %9, %cst [0] : vector<3x2x128xf32> to vector<2x128xf32>
    %13 = vector.shape_cast %12 : vector<2x128xf32> to vector<1x2x128xf32>
    %14 = vector.broadcast %13 : vector<1x2x128xf32> to vector<3x2x128xf32>
    %15 = arith.subf %9, %14 : vector<3x2x128xf32>
    %16 = math.exp %15 : vector<3x2x128xf32>
    %cst_9 = arith.constant dense<0.000000e+00> : vector<2x128xf32>
    %17 = vector.multi_reduction <add>, %16, %cst_9 [0] : vector<3x2x128xf32> to vector<2x128xf32>
    %18 = math.log %17 : vector<2x128xf32>
    %19 = vector.shape_cast %13 : vector<1x2x128xf32> to vector<2x128xf32>
    %20 = arith.addf %18, %19 : vector<2x128xf32>
    %21 = tpu.iota {dimensions = array<i32: 0>} : vector<3x2x128xi32>
    %22 = vector.shape_cast %11 : vector<2x128xi32> to vector<1x2x128xi32>
    %23 = vector.broadcast %22 : vector<1x2x128xi32> to vector<3x2x128xi32>
    %24 = arith.cmpi eq, %21, %23 : vector<3x2x128xi32>
    %cst_10 = arith.constant 0.000000e+00 : f32
    %25 = vector.broadcast %cst_10 : f32 to vector<3x2x128xf32>
    %26 = arith.select %24, %9, %25 : vector<3x2x128xi1>, vector<3x2x128xf32>
    %cst_11 = arith.constant dense<0.000000e+00> : vector<2x128xf32>
    %27 = vector.multi_reduction <add>, %26, %cst_11 [0] : vector<3x2x128xf32> to vector<2x128xf32>
    %c0_i32_12 = arith.constant 0 : i32
    %28 = vector.broadcast %c0_i32_12 : i32 to vector<2x128xi32>
    %29 = arith.cmpi sge, %11, %28 : vector<2x128xi32>
    %30 = arith.subf %20, %27 : vector<2x128xf32>
    %cst_13 = arith.constant 0.000000e+00 : f32
    %31 = vector.broadcast %cst_13 : f32 to vector<2x128xf32>
    %32 = arith.select %29, %30, %31 : vector<2x128xi1>, vector<2x128xf32>
    %c0_14 = arith.constant 0 : index
    %c0_15 = arith.constant 0 : index
    %33 = vector.load %arg10[%c0_14, %c0_15] : memref<1x1xf32, #tpu.memory_space<vmem>>, vector<1x1xf32>
    %34 = vector.shape_cast %32 : vector<2x128xf32> to vector<1x2x128xf32>
    %cst_16 = arith.constant dense<0.000000e+00> : vector<1xf32>
    %35 = vector.multi_reduction <add>, %34, %cst_16 [1, 2] : vector<1x2x128xf32> to vector<1xf32>
    %36 = vector.shape_cast %35 : vector<1xf32> to vector<1x1x1xf32>
    %37 = vector.extract %36[0, 0, 0] : f32 from vector<1x1x1xf32>
    %38 = vector.broadcast %37 : f32 to vector<1x1xf32>
    %39 = arith.addf %33, %38 : vector<1x1xf32>
    %c0_17 = arith.constant 0 : index
    %c0_18 = arith.constant 0 : index
    %40 = vector.load %arg10[%c0_17, %c0_18] : memref<1x1xf32, #tpu.memory_space<vmem>>, vector<1x1xf32>
    tpu.vector_store %arg10[%c0_17, %c0_18], %39 {strides = array<i32>} : memref<1x1xf32, #tpu.memory_space<vmem>>, vector<1x1xf32>,
    %41 = arith.extui %5 : i1 to i32
    %c0_i32_19 = arith.constant 0 : i32
    %42 = arith.cmpi ne, %41, %c0_i32_19 : i32
    scf.if %42 {
      %c0_20 = arith.constant 0 : index
      %c0_21 = arith.constant 0 : index
      %43 = vector.load %arg10[%c0_20, %c0_21] : memref<1x1xf32, #tpu.memory_space<vmem>>, vector<1x1xf32>
      %cst_22 = arith.constant 0.001953125 : f32
      %44 = vector.broadcast %cst_22 : f32 to vector<1x1xf32>
      %45 = arith.mulf %43, %44 : vector<1x1xf32>
      %c0_23 = arith.constant 0 : index
      %c0_24 = arith.constant 0 : index
      %46 = vector.load %arg2[%c0_23, %c0_24] : memref<16x128xf32, #tpu.memory_space<vmem>>, vector<16x128xf32>
      %c0_25 = arith.constant 0 : index
      %c0_26 = arith.constant 0 : index
      %47 = vector.load %arg3[%c0_25, %c0_26] : memref<16x128xf32, #tpu.memory_space<vmem>>, vector<16x128xf32>
      %48 = arith.subf %46, %47 : vector<16x128xf32>
      %49 = arith.mulf %48, %48 : vector<16x128xf32>
      %50 = vector.shape_cast %49 : vector<16x128xf32> to vector<1x16x128xf32>
      %cst_27 = arith.constant dense<0.000000e+00> : vector<1xf32>
      %51 = vector.multi_reduction <add>, %50, %cst_27 [1, 2] : vector<1x16x128xf32> to vector<1xf32>
      %52 = vector.shape_cast %51 : vector<1xf32> to vector<1x1x1xf32>
      %53 = vector.extract %52[0, 0, 0] : f32 from vector<1x1x1xf32>
      %54 = vector.broadcast %53 : f32 to vector<1x1xf32>
      %cst_28 = arith.constant 4.8828125E-4 : f32
      %55 = vector.broadcast %cst_28 : f32 to vector<1x1xf32>
      %56 = arith.mulf %54, %55 : vector<1x1xf32>
      %c0_29 = arith.constant 0 : index
      %c0_30 = arith.constant 0 : index
      %57 = vector.load %arg6[%c0_29, %c0_30] : memref<2x10xf32, #tpu.memory_space<vmem>>, vector<2x10xf32>
      %c0_31 = arith.constant 0 : index
      %c0_32 = arith.constant 0 : index
      %58 = vector.load %arg7[%c0_31, %c0_32] : memref<2x1xi32, #tpu.memory_space<vmem>>, vector<2x1xi32>
      %cst_33 = arith.constant dense<0xFF800000> : vector<2xf32>
      %59 = vector.multi_reduction <maximumf>, %57, %cst_33 [1] : vector<2x10xf32> to vector<2xf32>
      %60 = vector.shape_cast %59 : vector<2xf32> to vector<2x1xf32>
      %61 = vector.broadcast %60 : vector<2x1xf32> to vector<2x10xf32>
      %62 = arith.subf %57, %61 : vector<2x10xf32>
      %63 = math.exp %62 : vector<2x10xf32>
      %cst_34 = arith.constant dense<0.000000e+00> : vector<2xf32>
      %64 = vector.multi_reduction <add>, %63, %cst_34 [1] : vector<2x10xf32> to vector<2xf32>
      %65 = vector.shape_cast %64 : vector<2xf32> to vector<2x1xf32>
      %66 = math.log %65 : vector<2x1xf32>
      %67 = arith.addf %66, %60 : vector<2x1xf32>
      %68 = tpu.iota {dimensions = array<i32: 1>} : vector<2x10xi32>
      %69 = vector.broadcast %58 : vector<2x1xi32> to vector<2x10xi32>
      %70 = arith.cmpi eq, %68, %69 : vector<2x10xi32>
      %cst_35 = arith.constant 0.000000e+00 : f32
      %71 = vector.broadcast %cst_35 : f32 to vector<2x10xf32>
      %72 = arith.select %70, %57, %71 : vector<2x10xi1>, vector<2x10xf32>
      %cst_36 = arith.constant dense<0.000000e+00> : vector<2xf32>
      %73 = vector.multi_reduction <add>, %72, %cst_36 [1] : vector<2x10xf32> to vector<2xf32>
      %74 = vector.shape_cast %73 : vector<2xf32> to vector<2x1xf32>
      %75 = arith.subf %67, %74 : vector<2x1xf32>
      %76 = vector.shape_cast %75 : vector<2x1xf32> to vector<1x2x1xf32>
      %cst_37 = arith.constant dense<0.000000e+00> : vector<1xf32>
      %77 = vector.multi_reduction <add>, %76, %cst_37 [1, 2] : vector<1x2x1xf32> to vector<1xf32>
      %78 = vector.shape_cast %77 : vector<1xf32> to vector<1x1x1xf32>
      %79 = vector.extract %78[0, 0, 0] : f32 from vector<1x1x1xf32>
      %80 = vector.broadcast %79 : f32 to vector<1x1xf32>
      %cst_38 = arith.constant 5.000000e-01 : f32
      %81 = vector.broadcast %cst_38 : f32 to vector<1x1xf32>
      %82 = arith.mulf %80, %81 : vector<1x1xf32>
      %c0_39 = arith.constant 0 : index
      %c0_40 = arith.constant 0 : index
      %83 = vector.load %arg8[%c0_39, %c0_40] : memref<1x3xf32, #tpu.memory_space<vmem>>, vector<1x3xf32>
      %cst_41 = arith.constant 0.000000e+00 : f32
      %84 = vector.broadcast %cst_41 : f32 to vector<1x3xf32>
      %85 = arith.subf %84, %83 : vector<1x3xf32>
      %86 = math.exp %85 : vector<1x3xf32>
      %87 = vector.extract_strided_slice %86 {offsets = [0, 0], sizes = [1, 1], strides = [1, 1]} : vector<1x3xf32> to vector<1x1xf32>
      %88 = arith.mulf %87, %56 : vector<1x1xf32>
      %89 = vector.extract_strided_slice %83 {offsets = [0, 0], sizes = [1, 1], strides = [1, 1]} : vector<1x3xf32> to vector<1x1xf32>
      %90 = arith.addf %88, %89 : vector<1x1xf32>
      %91 = vector.extract_strided_slice %86 {offsets = [0, 1], sizes = [1, 1], strides = [1, 1]} : vector<1x3xf32> to vector<1x1xf32>
      %92 = arith.mulf %91, %45 : vector<1x1xf32>
      %93 = arith.addf %90, %92 : vector<1x1xf32>
      %94 = vector.extract_strided_slice %83 {offsets = [0, 1], sizes = [1, 1], strides = [1, 1]} : vector<1x3xf32> to vector<1x1xf32>
      %95 = arith.addf %93, %94 : vector<1x1xf32>
      %96 = vector.extract_strided_slice %86 {offsets = [0, 2], sizes = [1, 1], strides = [1, 1]} : vector<1x3xf32> to vector<1x1xf32>
      %97 = arith.mulf %96, %82 : vector<1x1xf32>
      %98 = arith.addf %95, %97 : vector<1x1xf32>
      %99 = vector.extract_strided_slice %83 {offsets = [0, 2], sizes = [1, 1], strides = [1, 1]} : vector<1x3xf32> to vector<1x1xf32>
      %100 = arith.addf %98, %99 : vector<1x1xf32>
      %101 = tpu.iota {dimensions = array<i32: 1>} : vector<1x4xi32>
      %c0_i32_42 = arith.constant 0 : i32
      %102 = vector.broadcast %c0_i32_42 : i32 to vector<1x4xi32>
      %103 = arith.cmpi eq, %101, %102 : vector<1x4xi32>
      %c1_i32_43 = arith.constant 1 : i32
      %104 = vector.broadcast %c1_i32_43 : i32 to vector<1x4xi32>
      %105 = arith.cmpi eq, %101, %104 : vector<1x4xi32>
      %c2_i32 = arith.constant 2 : i32
      %106 = vector.broadcast %c2_i32 : i32 to vector<1x4xi32>
      %107 = arith.cmpi eq, %101, %106 : vector<1x4xi32>
      %108 = vector.shape_cast %45 : vector<1x1xf32> to vector<1x1xf32>
      %109 = vector.broadcast %108 : vector<1x1xf32> to vector<1x4xf32>
      %110 = vector.shape_cast %82 : vector<1x1xf32> to vector<1x1xf32>
      %111 = vector.broadcast %110 : vector<1x1xf32> to vector<1x4xf32>
      %112 = arith.select %107, %109, %111 : vector<1x4xi1>, vector<1x4xf32>
      %113 = vector.shape_cast %56 : vector<1x1xf32> to vector<1x1xf32>
      %114 = vector.broadcast %113 : vector<1x1xf32> to vector<1x4xf32>
      %115 = arith.select %105, %114, %112 : vector<1x4xi1>, vector<1x4xf32>
      %116 = vector.shape_cast %100 : vector<1x1xf32> to vector<1x1xf32>
      %117 = vector.broadcast %116 : vector<1x1xf32> to vector<1x4xf32>
      %118 = arith.select %103, %117, %115 : vector<1x4xi1>, vector<1x4xf32>
      %c0_44 = arith.constant 0 : index
      %c0_45 = arith.constant 0 : index
      %119 = vector.load %arg9[%c0_44, %c0_45] : memref<1x4xf32, #tpu.memory_space<vmem>>, vector<1x4xf32>
      tpu.vector_store %arg9[%c0_44, %c0_45], %118 {strides = array<i32>} : memref<1x4xf32, #tpu.memory_space<vmem>>, vector<1x4xf32>,
    } else {
    }
    return
  }
  func.func @transform_0(%arg0: i32, %arg1: i32) -> (i32, i32) {
    %c0_i32 = arith.constant 0 : i32
    %c0_i32_0 = arith.constant 0 : i32
    %c0_i32_1 = arith.constant 0 : i32
    return %c0_i32, %c0_i32_0 : i32, i32
  }
  func.func @transform_1(%arg0: i32, %arg1: i32) -> (i32, i32) {
    %c0_i32 = arith.constant 0 : i32
    %c0_i32_0 = arith.constant 0 : i32
    %c0_i32_1 = arith.constant 0 : i32
    return %c0_i32, %c0_i32_0 : i32, i32
  }
  func.func @transform_2(%arg0: i32, %arg1: i32) -> (i32, i32, i32, i32) {
    %c0_i32 = arith.constant 0 : i32
    %c0_i32_0 = arith.constant 0 : i32
    %c0_i32_1 = arith.constant 0 : i32
    return %arg0, %c0_i32, %arg1, %c0_i32_0 : i32, i32, i32, i32
  }
  func.func @transform_3(%arg0: i32, %arg1: i32) -> (i32, i32, i32) {
    %c0_i32 = arith.constant 0 : i32
    %c0_i32_0 = arith.constant 0 : i32
    return %arg0, %arg1, %c0_i32 : i32, i32, i32
  }
  func.func @transform_4(%arg0: i32, %arg1: i32) -> (i32, i32) {
    %c0_i32 = arith.constant 0 : i32
    %c0_i32_0 = arith.constant 0 : i32
    %c0_i32_1 = arith.constant 0 : i32
    return %c0_i32, %c0_i32_0 : i32, i32
  }
  func.func @transform_5(%arg0: i32, %arg1: i32) -> (i32, i32) {
    %c0_i32 = arith.constant 0 : i32
    %c0_i32_0 = arith.constant 0 : i32
    %c0_i32_1 = arith.constant 0 : i32
    return %c0_i32, %c0_i32_0 : i32, i32
  }
  func.func @transform_6(%arg0: i32, %arg1: i32) -> (i32, i32) {
    %c0_i32 = arith.constant 0 : i32
    %c0_i32_0 = arith.constant 0 : i32
    %c0_i32_1 = arith.constant 0 : i32
    return %c0_i32, %c0_i32_0 : i32, i32
  }
  func.func @transform_7(%arg0: i32, %arg1: i32) -> (i32, i32) {
    %c0_i32 = arith.constant 0 : i32
    %c0_i32_0 = arith.constant 0 : i32
    %c0_i32_1 = arith.constant 0 : i32
    return %c0_i32, %c0_i32_0 : i32, i32
  }
}

</mosaic_0001>

<bundles_post_ra>
// kernel: tpu_custom_call.1
= control target key start
LH: loop header
LB: loop body
LE: loop exit
PB: predicated region body
PF: predicated region fallthrough
CT: control target
= control target key end

     0   :  { %12 = vsyncpa [#allocation4], 0  ;;  %s1267_s0 = inlined_call_operand.hbm [shape: f32[16,128], index: 0, kind: input, shape index: {}]   ;;  %s1268_s1 = inlined_call_operand.hbm [shape: f32[16,128], index: 1, kind: input, shape index: {}]   ;;  %s1269_s2 = inlined_call_operand.hbm [shape: f32[2,3,2,128], index: 2, kind: input, shape index: {}]   ;;  %s1270_s3 = inlined_call_operand.vmem [shape: s32[2,2,128], index: 3, kind: input, shape index: {}]   ;;  %s1271_s4 = inlined_call_operand.vmem [shape: f32[2,10], index: 4, kind: input, shape index: {}]   ;;  %s1272_s5 = inlined_call_operand.vmem [shape: s32[2,1], index: 5, kind: input, shape index: {}]   ;;  %s1273_s6 = inlined_call_operand.vmem [shape: f32[1,3], index: 6, kind: input, shape index: {}]   ;;  %s1274_s7 = inlined_call_operand.hbm [shape: f32[1,4], index: 7, kind: output, shape index: {}]  }
   0x1   :  { %13 = vsyncpa [#allocation7], 0 }
   0x2   :  { %14 = vsyncpa [#allocation5], 0  ;;  %s1007_s24 = smov 0   ;;  %s1009_s25 = smov 0  }
   0x3   :  { %s1011_s26 = smov 0   ;;  %s1013_s27 = smov 0  }
   0x4   :  { %s1015_s28 = smov 0   ;;  %s1017_s29 = smov 0  }
   0x5 LB: > { %s1036_s30 = sadd.s32 4294967295, %s952_s29   ;;  %p90_p0 = scmp.ne.s32.totalorder %s940_s26, %s936_s25  ;;  %s952_s29 = sphi %s1017_s29, %s20_s29   ;;  %s948_s28 = sphi %s1015_s28, %s1291_s28   ;;  %s944_s27 = sphi %s1013_s27, %s1290_s27   ;;  %s940_s26 = sphi %s1011_s26, %s1289_s26   ;;  %s936_s25 = sphi %s1009_s25, %s1288_s25   ;;  %s932_s24 = sphi %s1007_s24, %s1287_s24  }
   0x6   : > { %p91_p1 = scmp.eq.s32.totalorder %s952_s29, 0  ;;  %p96_p2 = scmp.ne.s32.totalorder %s936_s25, %s932_s24 }
   0x7   : > { %p1275_p3 = scmp.eq.s32.totalorder %s1036_s30, 0  ;;  %p644_p5 = scmp.ge.s32.totalorder %s952_s29, 1 }
   0x8   : > { %p92_p4 = por %p91_p1, %p90_p0  ;;  %p219_p7 = scmp.lt.s32.totalorder %s952_s29, 3 }
   0x9   : > { %p1047_p6 = por %p1275_p3, %p96_p2  ;;  %s954_s11 = smov [#allocation3]  }
   0xa   : > { %p1052_p8 = pnand %p644_p5, %p219_p7  ;;  %s231_s12 = sshll.u32 %s954_s11, 4  ;;  %s1056_s12 = int_to_ptr.vmem [resolvable:$true] %s231_s12 }
   0xb   : > { %s1277_s9 = scalar_select %p1047_p6, 1, 0 }
   0xc   : > { %p684_p9 = pneg %p1052_p8  ;;  %p697_p10 = scmp.lt.s32.totalorder %s952_s29, 2 }
   0xd   : > { %s955_s15 = smov [#allocation6]   ;;  %s778_s19 = scalar_lea.hbm %s1267_s0, 256 }
   0xe   : > { %p1063_p11 = pnand %p684_p9, %p1275_p3  ;;  %p1067_p12 = pnand %p697_p10, %p92_p4 }
   0xf   : > { %s244_s16 = sshll.u32 %s955_s15, 4  ;;  %p779_p13 = scmp.ne.s32.totalorder %s1267_s0, %s778_s19  ;;  %s1071_s16 = int_to_ptr.vmem [resolvable:$true] %s244_s16 }
  0x10   : > { %p780_p0 = pneg %p1063_p11  ;;  %p785_p4 = scmp.lt.u32.totalorder %s778_s19, %s1267_s0 }
  0x12   : > { %p781_p1 = pnand %p780_p0, %p779_p13 }
  0x14   : > { %p782_p2 = pneg %p781_p1 }
  0x16   : > { %p787_p5 = pnand %p785_p4, %p782_p2 }
  0x18   : > { %790 = shalt.err (!%p787_p5)
}
  0x19   : > { %s791_s24 = scalar_lea.vmem %s1056_s12, 256  ;;  %p799_p3 = scmp.lt.s32.totalorder %s1056_s12, %s1056_s12 }
  0x1a   : > { %p792_p7 = scmp.ne.s32.totalorder %s1056_s12, %s791_s24  ;;  %p800_p13 = scmp.lt.s32.totalorder %s791_s24, %s791_s24 }
  0x1c   : > { %p794_p9 = pnand %p792_p7, %p780_p0  ;;  %p801_p1 = por %p800_p13, %p799_p3 }
  0x1e   : > { %p795_p10 = pneg %p794_p9 }
  0x20   : > { %p802_p6 = pnand %p801_p1, %p795_p10 }
  0x22   : > { %805 = shalt.err (!%p802_p6)
}
  0x23   : > { %s956_s11 = smov 128   ;;  %s957_s15 = smov 8  }
  0x24   : > { %687 = dma.hbm_to_vmem [thread:$0]  (!%p1063_p11), %s1267_s0, 256, %s1056_s12, [#allocation4], %s956_s11, %s956_s11, %s957_s15  }
  0x25   : > { %s806_s21 = scalar_lea.hbm %s1268_s1, 256 }
  0x26   : > { %p807_p3 = scmp.ne.s32.totalorder %s1268_s1, %s806_s21  ;;  %p813_p4 = scmp.lt.u32.totalorder %s806_s21, %s1268_s1 }
  0x28   : > { %p809_p6 = pnand %p807_p3, %p780_p0 }
  0x2a   : > { %p810_p2 = pneg %p809_p6 }
  0x2c   : > { %p815_p5 = pnand %p813_p4, %p810_p2 }
  0x2e   : > { %818 = shalt.err (!%p815_p5)
}
  0x2f   : > { %s819_s12 = scalar_lea.vmem %s1071_s16, 256  ;;  %p827_p13 = scmp.lt.s32.totalorder %s1071_s16, %s1071_s16 }
  0x30   : > { %p820_p7 = scmp.ne.s32.totalorder %s1071_s16, %s819_s12  ;;  %p828_p1 = scmp.lt.s32.totalorder %s819_s12, %s819_s12 }
  0x32   : > { %p822_p9 = pnand %p820_p7, %p780_p0  ;;  %p829_p3 = por %p828_p1, %p827_p13 }
  0x34   : > { %p823_p10 = pneg %p822_p9 }
  0x36   : > { %p830_p6 = pnand %p829_p3, %p823_p10 }
  0x38   : > { %833 = shalt.err (!%p830_p6)
}
  0x39   : > { %690 = dma.hbm_to_vmem [thread:$0]  (!%p1063_p11), %s1268_s1, 256, %s1071_s16, [#allocation7], %s956_s11, %s956_s11, %s957_s15  }
  0x3a   : > { %s267_s18 = sand.u32 1, %s952_s29   ;;  %s32_s19 = sadd.s32 1, %s948_s28 }
  0x3b   : > { %p34_p0 = scmp.ge.s32.totalorder %s32_s19, 2  ;;  %s269_s20 = sand.u32 1, %s940_s26  }
  0x3c   : > { %s661_s21 = smul.u32 6, %s269_s20  ;;  %s1281_s16 = sadd.s32 1, %s940_s26 }
  0x3d   : > { %s1293_s19 = smov (%p34_p0, %s32_s19), 0  ;;  %s662_s13 = smul.u32 96, %s948_s28 }
  0x3e   : > { %s78_s22 = ssub.s32 %s948_s28, %s1293_s19  ;;  %s271_s23 = scalar_lea.vmem [#allocation8], %s661_s21 }
  0x3f   : > { %s279_s24 = sshll.u32 %s271_s23, 4  ;;  %p81_p2 = scmp.eq.s32.totalorder %s78_s22, 0  ;;  %s1138_s24 = int_to_ptr.vmem [resolvable:$true] %s279_s24 }
  0x40   : > { %s1136_s17 = scalar_lea.hbm %s1269_s2, %s662_s13  ;;  %s1145_s15 = scalar_lea.sflag [#allocation4], %s267_s18 }
  0x41   : > { %s1143_s11 = scalar_select %p81_p2, %s940_s26, %s1281_s16  }
  0x42   : > { %s834_s20 = scalar_lea.hbm %s1136_s17, 96  ;;  %p836_p4 = pneg %p1067_p12 }
  0x43   : > { %p835_p11 = scmp.ne.s32.totalorder %s1136_s17, %s834_s20  ;;  %s839_s22 = scalar_lea.hbm %s1269_s2, 192 }
  0x44   : > { %p840_p9 = scmp.lt.u32.totalorder %s1136_s17, %s1269_s2  ;;  %p841_p10 = scmp.lt.u32.totalorder %s839_s22, %s834_s20 }
  0x45   : > { %p837_p5 = pnand %p836_p4, %p835_p11  ;;  %p843_p1 = scmp.lt.u32.totalorder %s834_s20, %s1136_s17 }
  0x46   : > { %p842_p13 = por %p841_p10, %p840_p9 }
  0x47   : > { %p838_p7 = pneg %p837_p5 }
  0x48   : > { %p844_p3 = por %p843_p1, %p842_p13 }
  0x4a   : > { %p845_p6 = pnand %p844_p3, %p838_p7 }
  0x4c   : > { %848 = shalt.err (!%p845_p6)
}
  0x4d   : > { %s849_s18 = scalar_lea.vmem %s1138_s24, 96  ;;  %s958_s8 = smov [#allocation8]  }
  0x4e   : > { %p850_p0 = scmp.ne.s32.totalorder %s1138_s24, %s849_s18  ;;  %s854_s16 = sshll.u32 %s958_s8, 4  ;;  %s855_s16 = int_to_ptr.vmem [resolvable:$false] %s854_s16 }
  0x4f   : > { %s856_s21 = scalar_lea.vmem %s855_s16, 192  ;;  %p857_p5 = scmp.lt.s32.totalorder %s1138_s24, %s855_s16 }
  0x50   : > { %p852_p2 = pnand %p850_p0, %p836_p4  ;;  %p858_p9 = scmp.lt.s32.totalorder %s856_s21, %s849_s18 }
  0x52   : > { %p853_p11 = pneg %p852_p2  ;;  %p859_p10 = por %p858_p9, %p857_p5 }
  0x54   : > { %p860_p13 = pnand %p859_p10, %p853_p11 }
  0x56   : > { %863 = shalt.err (!%p860_p13)
}
  0x57   : > { %s959_s20 = smov 32   ;;  %s960_s13 = smov 2  }
  0x58   : > { %694 = dma.hbm_to_vmem [thread:$0]  (!%p1067_p12), %s1136_s17, 96, %s1138_s24, %s1145_s15, %s959_s20, %s959_s20, %s960_s13  }
  0x59   : > { %301 = sbr.rel (%p1052_p8) target bundleno = 971 (0x3cb), region = 48  ;;  %p1282_p4 = scmp.eq.s32.totalorder (!%p1052_p8), %s1036_s30, 0 }
  0x60   : > { %915 = dma.done.wait (%p1282_p4), [#allocation4], 256   ;;  %p1283_p7 = pmov %p1282_p4 }
  0x61   : > { %p1284_p1 = pmov %p1282_p4 }
  0x62   : > { %917 = vsyncadd (%p1283_p7), [#allocation4], 4294967040 }
  0x63   : > { %919 = dma.done.wait (%p1284_p1), [#allocation7], 256   ;;  %p1285_p3 = pmov %p1284_p1 }
  0x64   : > { %s311_s14 = sand.u32 1, %s1036_s30   ;;  %s313_s24 = sand.u32 1, %s936_s25  }
  0x65   : > { %921 = vsyncadd (%p1285_p3), [#allocation7], 4294967040  ;;  %s663_s17 = smul.u32 6, %s313_s24  ;;  %s312_s10 = scalar_lea.sflag [#allocation4], %s311_s14 }
  0x66   : > { %p1286_p8 = scmp.ne.s32.totalorder %s1277_s9, 0 }
  0x67   : > { %s315_s15 = scalar_lea.vmem [#allocation8], %s663_s17 }
  0x68   : > { %923 = dma.done.wait (%p1286_p8), %s312_s10, 96  }
  0x69   : > { %925 = vsyncadd (%p1286_p8), %s312_s10, 4294967200  ;;  %p348_p12 = scmp.lt.s32.totalorder %s944_s27, 1  ;;  %p355_p6 = scmp.eq.s32.totalorder %s944_s27, 0 }
  0x6a   : > { %p359_p0 = scmp.eq.s32.totalorder %s944_s27, 1  ;;  %vm364_vm0 = vcmask (%p355_p6), 0   ;;  %v961_v0 = vmov (%p355_p6), 0.0  }
  0x6b   : > { %s349_s22 = scalar_select %p348_p12, %s944_s27, 1 }
  0x6c   : > { %363 = sbr.rel (!%p355_p6) target bundleno = 115 (0x73), region = 64  ;;  %365 = vst.msk [vmem:[#allocation2] sm:$0x1] (%p355_p6), %vm364_vm0, %v961_v0 }
  0x6d   : > { %s652_s23 = sshll.u32 %s349_s22, 1 }
  0x6e   : > { %s354_s8 = scalar_lea.vmem %s1270_s3, %s652_s23 }
  0x73 PF: > { %v366_v1 = vld [vmem:[%s315_s15] sm:$0x3]  ;;  %v367_v2 = vld [vmem:[%s315_s15 + $0x2] sm:$0x3]  ;;  %v368_v3 = vld [vmem:[%s315_s15 + $0x4] sm:$0x3]  ;;  %v461_v57 = vlaneseq (%p359_p0) }
  0x74   : > { %vm370_vm1 = vcmask 1041408   ;;  %v369_v19 = vld [vmem:[%s354_s8] sm:$0x3]  ;;  %vm420_vm6 = vcmask 0   ;;  %vm448_vm7 = vcmask (%p359_p0), 74752   ;;  %v962_v50 = vmov (%p359_p0), 0  }
  0x75   : > { %v371_v4 = vsel %vm370_vm1, %v366_v1, -inf  ;;  %v372_v5 = vsel %vm370_vm1, %v367_v2, -inf  ;;  %v373_v6 = vsel %vm370_vm1, %v368_v3, -inf  ;;  %vm393_vm2 = vcmp.eq.s32.totalorder %v369_v19, 0  ;;  %v407_v45 = vld [vmem:[#allocation2] sm:$0x1]  ;;  %770 = vset.pattern.permute.xlu0 (%p359_p0), %v962_v50  ;;  %771 = vset.pattern.permute.xlu1 (%p359_p0), %v962_v50 }
  0x76   : > { %v374_v7 = vmax.f32 %v371_v4, %v372_v5  ;;  %vm394_vm3 = vcmp.eq.s32.totalorder %v369_v19, 1  ;;  %v396_v24 = vsel %vm393_vm2, %v366_v1, 0.0  ;;  %vm395_vm4 = vcmp.eq.s32.totalorder %v369_v19, 2  ;;  %v446_v48 = vld [vmem:[%s1271_s4] sm:$0x3] (%p359_p0)  ;;  %s963_s27 = smov (%p359_p0), 1  }
  0x77   : > { %v397_v25 = vsel %vm394_vm3, %v367_v2, 0.0  ;;  %v399_v26 = vsel %vm370_vm1, %v396_v24, 0.0  ;;  %v398_v28 = vsel %vm395_vm4, %v368_v3, 0.0  ;;  %vm404_vm5 = vcmp.ge.s32.totalorder %v369_v19, 0  ;;  %v447_v51 = vld [vmem:[%s1272_s5] sm:$0x3] (%p359_p0) }
  0x78   : > { %v375_v8 = vmax.f32 %v374_v7, %v373_v6  ;;  %v400_v27 = vsel %vm370_vm1, %v397_v25, 0.0  ;;  %v402_v30 = vsel %vm370_vm1, %v398_v28, 0.0  ;;  %v449_v49 = vsel (%p359_p0), %vm448_vm7, %v446_v48, -inf  ;;  %v426_v0 = vld [vmem:[#allocation3] sm:$0xff] (%p359_p0)  ;;  %s964_s17 = smov (%p359_p0), 127   ;;  %s965_s22 = smov (%p359_p0), 126  }
  0x79   : > { %v401_v29 = vadd.f32 %v400_v27, %v399_v26  ;;  %v1215_v58 = vand.u32 (%p359_p0), 127, %v461_v57  ;;  %vm472_vm9 = vcmask (%p359_p0), 1024   ;;  %vm539_vm13 = vcmask (%p359_p0), 24576  }
  0x7a   : > { %v376_v9 = vsub.f32 %v366_v1, %v375_v8  ;;  %v377_v10 = vsub.f32 %v367_v2, %v375_v8  ;;  %v378_v11 = vsub.f32 %v368_v3, %v375_v8  ;;  %v427_v1 = vld [vmem:[#allocation3 + $0x8] sm:$0xff] (%p359_p0)  ;;  %v428_v2 = vld [vmem:[#allocation6] sm:$0xff] (%p359_p0)  ;;  %v429_v3 = vld [vmem:[#allocation6 + $0x8] sm:$0xff] (%p359_p0) }
  0x7b   : > { %v403_v33 = vadd.f32 %v402_v30, %v401_v29  ;;  %v430_v4 = vsub.f32 (%p359_p0), %v426_v0, %v428_v2  ;;  %v431_v5 = vsub.f32 (%p359_p0), %v427_v1, %v429_v3  ;;  %vm518_vm10 = vcmp.eq.s32.totalorder (%p359_p0), %v1215_v58, 2 }
  0x7c   : > { %v379_v12 = vmul.f32 1.442695, %v376_v9  ;;  %v381_v13 = vmul.f32 1.442695, %v377_v10  ;;  %v383_v14 = vmul.f32 1.442695, %v378_v11 }
  0x7d   : > { %v432_v6 = vmul.f32 (%p359_p0), %v430_v4, %v430_v4  ;;  %v433_v7 = vmul.f32 (%p359_p0), %v431_v5, %v431_v5  ;;  %vm517_vm11 = vcmp.eq.s32.totalorder (%p359_p0), %v1215_v58, 1  ;;  %vm516_vm12 = vcmp.eq.s32.totalorder (%p359_p0), %v1215_v58, 0 }
  0x7e   : > { %762 = vpow2.f32 %v379_v12 }
  0x7f   : > { %764 = vpow2.f32 %v381_v13 }
  0x80   : > { %766 = vpow2.f32 %v383_v14 }
  0x88   : > { %v763_v15 = vpop.eup %762 }
  0x89   : > { %v765_v16 = vpop.eup %764  ;;  %v385_v17 = vsel %vm370_vm1, %v763_v15, 0.0 }
  0x8a   : > { %v767_v18 = vpop.eup %766  ;;  %v386_v20 = vsel %vm370_vm1, %v765_v16, 0.0 }
  0x8b   : > { %v387_v21 = vadd.f32 %v386_v20, %v385_v17  ;;  %v388_v22 = vsel %vm370_vm1, %v767_v18, 0.0 }
  0x8d   : > { %v389_v23 = vadd.f32 %v388_v22, %v387_v21 }
  0x8f   : > { %768 = vlog2.f32 %v389_v23  ;;  %v485_v23 = vld [vmem:[%s1273_s6] sm:$0x1] (%p359_p0) }
  0x90   : > { %v486_v24 = vsub.f32 (%p359_p0), 0.0, %v485_v23 }
  0x92   : > { %v487_v25 = vmul.f32 (%p359_p0), 1.442695, %v486_v24 }
  0x99   : > { %v769_v31 = vpop.eup %768 }
  0x9a   : > { %v391_v32 = vmul.f32 0.6931472, %v769_v31 }
  0x9c   : > { %v392_v34 = vadd.f32 %v391_v32, %v375_v8  ;;  %v434_v8 = vadd.f32 (%p359_p0), %v433_v7, %v432_v6 }
  0x9e   : > { %v405_v35 = vsub.f32 %v392_v34, %v403_v33 }
  0xa0   : > { %v406_v36 = vsel %vm404_vm5, %v405_v35, 0.0 }
  0xa1   : > { %v408_v37 = vsel %vm370_vm1, %v406_v36, 0.0  ;;  %v524_v36 = vshrl.u32 (%p359_p0), %v461_v57, 7 }
  0xa2   : > { %409 = vadd.xlane.f32.xlu0 %v408_v37 }
  0xa3   : > { %v525_v37 = vsub.s32 (%p359_p0), 0, %v524_v36 }
  0xa6   : > { %450 = vmax.xlane.f32.xlu0 (%p359_p0), %v449_v49 }
  0xbc   : > { %464 = vperm.xlu0 (%p359_p0), %770, %v447_v51  }
 0x12f   : > { %v410_v38 = vpop.xlane.xlu0 %409 }
 0x130   : > { %v411_v39 = vrot.slane %v410_v38, 4 }
 0x132   : > { %v412_v40 = vadd.f32 %v411_v39, %v410_v38 }
 0x133   : > { %v451_v54 = vpop.xlane.xlu0 (%p359_p0), %450 }
 0x134   : > { %v413_v41 = vrot.slane %v412_v40, 2  ;;  %v452_v55 = vsub.f32 (%p359_p0), %v446_v48, %v451_v54 }
 0x136   : > { %v414_v42 = vadd.f32 %v413_v41, %v412_v40  ;;  %v453_v56 = vmul.f32 (%p359_p0), 1.442695, %v452_v55 }
 0x138   : > { %v415_v43 = vrot.slane %v414_v42, 1  ;;  %772 = vpow2.f32 (%p359_p0), %v453_v56 }
 0x13a   : > { %v416_v44 = vadd.f32 %v415_v43, %v414_v42 }
 0x13b   : > { %v465_v59 = vpop.permute.xlu0 (%p359_p0), %464 }
 0x13c   : > { %664 = vpush %v416_v44  ;;  %vm466_vm8 = vcmp.eq.s32.totalorder (%p359_p0), %v1215_v58, %v465_v59 }
 0x13d   : > { %v467_v61 = vsel (%p359_p0), %vm466_vm8, %v446_v48, 0.0 }
 0x13e   : > { %v468_v63 = vsel (%p359_p0), %vm448_vm7, %v467_v61, 0.0 }
 0x142   : > { %v773_v60 = vpop.eup (%p359_p0), %772 }
 0x143   : > { %v455_v62 = vsel (%p359_p0), %vm448_vm7, %v773_v60, 0.0 }
 0x144   : > { %456 = vadd.xlane.f32.xlu1 (%p359_p0), %v455_v62 }
 0x148   : > { %469 = vadd.xlane.f32.xlu1 (%p359_p0), %v468_v63 }
 0x14c   : > { %435 = vadd.xlane.f32.xlu1 (%p359_p0), %v434_v8 }
 0x16b   : > { %423 = sbr.rel (!%p359_p0) target bundleno = 946 (0x3b2), region = 68 }
 0x16d   : > { %s665_s9 = spop %664 }
 0x16e   : > { %v418_v46 = vstv %s665_s9 }
 0x16f   : > { %v419_v47 = vadd.f32 %v418_v46, %v407_v45 }
 0x171   : > { %421 = vst.msk [vmem:[#allocation2] sm:$0x1] %vm420_vm6, %v419_v47 }
 0x178   : > { %v424_v52 = vld [vmem:[#allocation2] sm:$0x1] }
 0x179   : > { %v425_v53 = vmul.f32 0.001953125, %v424_v52 }
 0x17b   : > { %520 = vperm.xlu0 %770, %v425_v53  }
 0x1d1   : > { %v457_v9 = vpop.xlane.xlu1 %456 }
 0x1d2   : > { %774 = vlog2.f32 %v457_v9 }
 0x1d3   : > { %776 = vpow2.f32 %v487_v25 }
 0x1d5   : > { %v470_v12 = vpop.xlane.xlu1 %469 }
 0x1d9   : > { %v436_v16 = vpop.xlane.xlu1 %435 }
 0x1da   : > { %v437_v17 = vrot.slane %v436_v16, 4 }
 0x1dc   : > { %v775_v10 = vpop.eup %774  ;;  %v438_v18 = vadd.f32 %v437_v17, %v436_v16 }
 0x1dd   : > { %v459_v11 = vmul.f32 0.6931472, %v775_v10  ;;  %v777_v28 = vpop.eup %776 }
 0x1de   : > { %v439_v19 = vrot.slane %v438_v18, 2 }
 0x1df   : > { %v460_v13 = vadd.f32 %v459_v11, %v451_v54 }
 0x1e0   : > { %v440_v20 = vadd.f32 %v439_v19, %v438_v18 }
 0x1e1   : > { %v471_v14 = vsub.f32 %v460_v13, %v470_v12 }
 0x1e2   : > { %v441_v21 = vrot.slane %v440_v20, 1 }
 0x1e3   : > { %v473_v15 = vsel %vm472_vm9, %v471_v14, 0.0 }
 0x1e4   : > { %474 = vadd.xlane.f32.xlu1 %v473_v15  ;;  %v442_v22 = vadd.f32 %v441_v21, %v440_v20 }
 0x1e6   : > { %666 = vpush %v442_v22 }
 0x1f5   : > { %492 = vrot.lane.b32.xlu1 %v425_v53, %s963_s27 }
 0x1fa   : > { %v521_v38 = vpop.permute.xlu0 %520 }
 0x1fb   : > { %v526_v40 = vrot.slane %v521_v38, %v525_v37 }
 0x217   : > { %s667_s10 = spop %666 }
 0x218   : > { %v444_v44 = vstv %s667_s10 }
 0x219   : > { %v445_v45 = vmul.f32 0.00048828125, %v444_v44 }
 0x21b   : > { %v489_v47 = vmul.f32 %v777_v28, %v445_v45 }
 0x21d   : > { %v490_v49 = vadd.f32 %v489_v47, %v485_v23 }
 0x271   : > { %v475_v26 = vpop.xlane.xlu1 %474 }
 0x272   : > { %v476_v27 = vrot.slane %v475_v26, 4 }
 0x274   : > { %v477_v29 = vadd.f32 %v476_v27, %v475_v26 }
 0x275   : > { %v493_v30 = vpop.permute.xlu1 %492 }
 0x276   : > { %v478_v31 = vrot.slane %v477_v29, 2  ;;  %v495_v32 = vmul.f32 %v777_v28, %v493_v30 }
 0x278   : > { %497 = vrot.lane.b32.xlu1 %v495_v32, %s964_s17  ;;  %v479_v33 = vadd.f32 %v478_v31, %v477_v29 }
 0x27a   : > { %v480_v34 = vrot.slane %v479_v33, 1 }
 0x27c   : > { %502 = vrot.lane.b32.xlu1 %v485_v23, %s964_s17  ;;  %v481_v35 = vadd.f32 %v480_v34, %v479_v33 }
 0x27e   : > { %668 = vpush %v481_v35 }
 0x2af   : > { %s669_s15 = spop %668 }
 0x2b0   : > { %v483_v39 = vstv %s669_s15 }
 0x2b1   : > { %v484_v41 = vmul.f32 0.5, %v483_v39 }
 0x2b3   : > { %v506_v42 = vmul.f32 %v777_v28, %v484_v41  ;;  %v527_v43 = vsel %vm518_vm10, %v526_v40, %v484_v41 }
 0x2b4   : > { %v528_v59 = vsel %vm517_vm11, %v445_v45, %v527_v43 }
 0x2b5   : > { %508 = vrot.lane.b32.xlu1 %v506_v42, %s965_s22 }
 0x2b9   : > { %512 = vrot.lane.b32.xlu1 %v485_v23, %s965_s22 }
 0x2ea   : > { %v498_v46 = vpop.permute.xlu1 %497 }
 0x2eb   : > { %v500_v50 = vadd.f32 %v498_v46, %v490_v49 }
 0x2ee   : > { %v503_v48 = vpop.permute.xlu1 %502 }
 0x2ef   : > { %v505_v52 = vadd.f32 %v503_v48, %v500_v50 }
 0x327   : > { %v509_v51 = vpop.permute.xlu1 %508 }
 0x328   : > { %v511_v53 = vadd.f32 %v509_v51, %v505_v52 }
 0x32b   : > { %v513_v54 = vpop.permute.xlu1 %512 }
 0x32c   : > { %v515_v55 = vadd.f32 %v513_v54, %v511_v53 }
 0x32e   : > { %531 = vperm.xlu1 %771, %v515_v55  }
 0x3ad   : > { %v532_v56 = vpop.permute.xlu1 %531 }
 0x3ae   : > { %v537_v57 = vrot.slane %v532_v56, %v525_v37 }
 0x3b0   : > { %v538_v60 = vsel %vm516_vm12, %v537_v57, %v528_v59 }
 0x3b1   : > { %540 = vst.msk [vmem:[#allocation9] sm:$0x1] %vm539_vm13, %v538_v60 }
 0x3b2 PF: > { %p700_p2 = scmp.eq.s32.totalorder %s1036_s30, 1  ;;  %s966_s23 = smov [#allocation9]  }
 0x3b3   : > { %s548_s12 = sshll.u32 %s966_s23, 4  ;;  %s549_s12 = int_to_ptr.vmem [resolvable:$true] %s548_s12 }
 0x3b4   : > { %s864_s18 = scalar_lea.vmem %s549_s12, 16  ;;  %s870_s8 = scalar_lea.vmem %s549_s12, 32 }
 0x3b5   : > { %p865_p11 = scmp.ne.s32.totalorder %s549_s12, %s864_s18  ;;  %p871_p10 = scmp.lt.s32.totalorder %s549_s12, %s549_s12 }
 0x3b6   : > { %p872_p13 = scmp.lt.s32.totalorder %s870_s8, %s864_s18 }
 0x3b7   : > { %p866_p5 = pnand %p865_p11, %p700_p2 }
 0x3b8   : > { %p873_p4 = por %p872_p13, %p871_p10 }
 0x3b9   : > { %p867_p9 = pneg %p866_p5 }
 0x3bb   : > { %p874_p7 = pnand %p873_p4, %p867_p9 }
 0x3bd   : > { %877 = shalt.err (!%p874_p7)
}
 0x3be   : > { %s878_s21 = scalar_lea.hbm %s1274_s7, 16 }
 0x3bf   : > { %p879_p1 = scmp.ne.s32.totalorder %s1274_s7, %s878_s21  ;;  %p884_p12 = scmp.lt.u32.totalorder %s878_s21, %s1274_s7 }
 0x3c1   : > { %p880_p3 = pnand %p879_p1, %p700_p2 }
 0x3c3   : > { %p881_p8 = pneg %p880_p3 }
 0x3c5   : > { %p886_p6 = pnand %p884_p12, %p881_p8 }
 0x3c7   : > { %889 = shalt.err (!%p886_p6)
}
 0x3c8   : > { %681 = dma.vmem_to_hbm [thread:$0]  (%p700_p2), %s549_s12, 16, %s1274_s7, [#allocation5]  }
 0x3c9   : > { %927 = dma.done.wait (%p700_p2), [#allocation5], 16  }
 0x3ca   : > { %929 = vsyncadd (%p700_p2), [#allocation5], 4294967280 }
 0x3cb PF: > { %s20_s29 = sadd.s32 1, %s952_s29   ;;  %s1287_s24 = smov %s936_s25 }
 0x3cc   : > { %p17_p0 = scmp.ge.s32.totalorder %s20_s29, 4   ;;  %s1288_s25 = smov %s940_s26 }
 0x3cd   : > { %s1289_s26 = smov %s1143_s11  ;;  %s1290_s27 = smov %s948_s28 }
 0x3ce   : > { %s1291_s28 = smov %s1293_s19  ;;  %19 = sbr.rel (!%p17_p0) target bundleno = 5 (0x5), region = 103 }
 0x3d5   :  { %561 = vsyncpa [#allocation4], 1 }
 0x3d6   :  { %563 = vsyncpa [#allocation4 + $0x1], 1 }
 0x3d7   :  { %564 = vsyncpa [#allocation7], 1 }
 0x3d8   :  { %565 = vsyncpa [#allocation5], 1 }
 0x3d9   :  { %567 = vsyncpa [#allocation5 + $0x1], 1 }

</bundles_post_ra>
